<compile_context>
chip_gen: v7x
topology: tpu7x:2x2x1
jax: 0.10.0
libtpu: 0.0.40
codegen_flags: <defaults>
</compile_context>

<pallas_src>
import jax
import jax.numpy as jnp
from jax.experimental import pallas as pl
from jax.experimental.pallas import tpu as pltpu

_LANE = 128
_MAX_TILE_ROWS = 4096  # 4096 * 128 * 4B = 2 MiB per input block


def _make_kernel(rows, tile_rows, lane, steps_per_core, needs_mask):
    def kernel(pred_ref, tgt_ref, part_ref, acc_loss, acc_cnt):
        c = pl.program_id(0)  # parallel (core) axis
        j = pl.program_id(1)  # arbitrary (streaming/reduction) axis

        @pl.when(j == 0)
        def _():
            acc_loss[...] = jnp.zeros_like(acc_loss)
            acc_cnt[...] = jnp.zeros_like(acc_cnt)

        p = pred_ref[...].astype(jnp.float32)
        t = tgt_ref[...].astype(jnp.float32)

        pos = t > 0.0
        if needs_mask:
            # Mask rows beyond the real extent (tail block may read padding
            # with undefined contents; jnp.where keeps NaNs from propagating).
            row0 = (c * steps_per_core + j) * tile_rows
            row_ids = (
                jax.lax.broadcasted_iota(jnp.int32, (tile_rows, lane), 0) + row0
            )
            pos = jnp.logical_and(pos, row_ids < rows)

        # Pure VPU element-wise accumulation; no per-step cross-lane reduce.
        acc_loss[...] += jnp.where(pos, jnp.abs(p - t), 0.0)
        acc_cnt[...] += jnp.where(pos, 1.0, 0.0)

        @pl.when(j == pl.num_programs(1) - 1)
        def _():
            loss_sum = jnp.sum(acc_loss[...])
            cnt_sum = jnp.sum(acc_cnt[...])
            # Row 0 of the (1, 2, lane) output block carries loss_sum,
            # row 1 carries the positive count (broadcast across lanes).
            sel = jax.lax.broadcasted_iota(jnp.int32, (1, 2, lane), 1) == 0
            part_ref[...] = jnp.where(sel, loss_sum, cnt_sum)

    return kernel


def pos_l1_loss(output, target):
    """output: (b, 1, h, w), target: (b, h, w) -> scalar f32 loss."""
    b, one, h, w = output.shape
    assert one == 1
    assert target.shape == (b, h, w)

    n = b * h * w
    lane = _LANE

    pred_flat = output.reshape(-1)
    tgt_flat = target.reshape(-1)

    # Pad only the 1-D tail (< 128 elements) when needed; padded zeros have
    # mask == 0 and never contribute.
    pad = (-n) % lane
    if pad:
        pred_flat = jnp.pad(pred_flat, (0, pad))
        tgt_flat = jnp.pad(tgt_flat, (0, pad))
    rows = (n + pad) // lane

    pred2d = pred_flat.reshape(rows, lane)
    tgt2d = tgt_flat.reshape(rows, lane)

    # Block sizing: big streaming tiles; if everything fits in one block,
    # use the full row extent (allowed even when not a multiple of 8).
    tile_rows = rows if rows <= _MAX_TILE_ROWS else _MAX_TILE_ROWS
    steps_total = -(-rows // tile_rows)

    # 2-way core split (v7x megacore) only when it divides evenly; harmless
    # (serialized) on single-TC chips.
    if steps_total >= 2 and steps_total % 2 == 0:
        nc = 2
        steps_per_core = steps_total // 2
    else:
        nc = 1
        steps_per_core = steps_total

    needs_mask = steps_total * tile_rows != rows

    kernel = _make_kernel(rows, tile_rows, lane, steps_per_core, needs_mask)

    row_block_map = lambda c, j: (c * steps_per_core + j, 0)

    partials = pl.pallas_call(
        kernel,
        out_shape=jax.ShapeDtypeStruct((nc, 2, lane), jnp.float32),
        grid_spec=pltpu.PrefetchScalarGridSpec(
            num_scalar_prefetch=0,
            grid=(nc, steps_per_core),
            in_specs=[
                pl.BlockSpec((tile_rows, lane), row_block_map),
                pl.BlockSpec((tile_rows, lane), row_block_map),
            ],
            out_specs=pl.BlockSpec((1, 2, lane), lambda c, j: (c, 0, 0)),
            scratch_shapes=[
                pltpu.VMEM((tile_rows, lane), jnp.float32),
                pltpu.VMEM((tile_rows, lane), jnp.float32),
            ],
        ),
        compiler_params=pltpu.CompilerParams(
            dimension_semantics=("parallel", "arbitrary"),
            vmem_limit_bytes=32 * 1024 * 1024,
        ),
    )(pred2d, tgt2d)

    loss_sum = jnp.sum(partials[:, 0, 0])
    num_pos = jnp.sum(partials[:, 1, 0])
    # Matches the PyTorch module: no clamp, num_pos == 0 -> NaN.
    return loss_sum / num_pos


def _reference(output, target):
    target = target[:, None, :, :]
    mask = (target > 0).astype(jnp.float32)
    num_pos = mask.sum()
    return jnp.sum(jnp.abs(output * mask - target * mask)) / num_pos


if __name__ == "__main__":
    key = jax.random.PRNGKey(0)
    k1, k2 = jax.random.split(key)

    b, h, w = 2, 16, 16
    output = jax.random.normal(k1, (b, 1, h, w), dtype=jnp.float32)
    # target: mix of zeros and positive values (like a heatmap)
    target = jax.nn.relu(jax.random.normal(k2, (b, h, w), dtype=jnp.float32))

    loss = pos_l1_loss(output, target)
    jax.block_until_ready(loss)

    ref = _reference(output, target)
    assert jnp.allclose(loss, ref, rtol=1e-5, atol=1e-6), (loss, ref)

    print("KERNEL_OK")
</pallas_src>

<mosaic_0001>
module attributes {stable_mosaic.version = 11 : i64} {
  func.func @kernel(%arg0: i32, %arg1: i32, %arg2: memref<4x128xf32, #tpu.memory_space<vmem>>, %arg3: memref<4x128xf32, #tpu.memory_space<vmem>>, %arg4: memref<1x2x128xf32, #tpu.memory_space<vmem>>, %arg5: memref<4x128xf32, #tpu.memory_space<vmem>>, %arg6: memref<4x128xf32, #tpu.memory_space<vmem>>) attributes {dimension_semantics = [#tpu.dimension_semantics<parallel>, #tpu.dimension_semantics<arbitrary>], iteration_bounds = array<i64: 1, 1>, scalar_prefetch = 0 : i64, scratch_operands = 2 : i64, tpu.core_type = #tpu.core_type<tc>, window_params = [{transform_indices = @transform_0, window_bounds = array<i64: 4, 128>}, {transform_indices = @transform_1, window_bounds = array<i64: 4, 128>}, {transform_indices = @transform_2, window_bounds = array<i64: 1, 2, 128>}]} {
    %c0_i32 = arith.constant 0 : i32
    %0 = arith.cmpi eq, %arg1, %c0_i32 : i32
    %1 = arith.extui %0 : i1 to i32
    %c0_i32_0 = arith.constant 0 : i32
    %2 = arith.cmpi ne, %1, %c0_i32_0 : i32
    scf.if %2 {
      %cst_17 = arith.constant 0.000000e+00 : f32
      %23 = vector.broadcast %cst_17 : f32 to vector<4x128xf32>
      %c0_18 = arith.constant 0 : index
      %c0_19 = arith.constant 0 : index
      %24 = vector.load %arg5[%c0_18, %c0_19] : memref<4x128xf32, #tpu.memory_space<vmem>>, vector<4x128xf32>
      tpu.vector_store %arg5[%c0_18, %c0_19], %23 {strides = array<i32>} : memref<4x128xf32, #tpu.memory_space<vmem>>, vector<4x128xf32>,
      %cst_20 = arith.constant 0.000000e+00 : f32
      %25 = vector.broadcast %cst_20 : f32 to vector<4x128xf32>
      %c0_21 = arith.constant 0 : index
      %c0_22 = arith.constant 0 : index
      %26 = vector.load %arg6[%c0_21, %c0_22] : memref<4x128xf32, #tpu.memory_space<vmem>>, vector<4x128xf32>
      tpu.vector_store %arg6[%c0_21, %c0_22], %25 {strides = array<i32>} : memref<4x128xf32, #tpu.memory_space<vmem>>, vector<4x128xf32>,
    } else {
    }
    %c0 = arith.constant 0 : index
    %c0_1 = arith.constant 0 : index
    %3 = vector.load %arg2[%c0, %c0_1] : memref<4x128xf32, #tpu.memory_space<vmem>>, vector<4x128xf32>
    %c0_2 = arith.constant 0 : index
    %c0_3 = arith.constant 0 : index
    %4 = vector.load %arg3[%c0_2, %c0_3] : memref<4x128xf32, #tpu.memory_space<vmem>>, vector<4x128xf32>
    %cst = arith.constant 0.000000e+00 : f32
    %5 = vector.broadcast %cst : f32 to vector<4x128xf32>
    %6 = arith.cmpf ogt, %4, %5 : vector<4x128xf32>
    %c0_4 = arith.constant 0 : index
    %c0_5 = arith.constant 0 : index
    %7 = vector.load %arg5[%c0_4, %c0_5] : memref<4x128xf32, #tpu.memory_space<vmem>>, vector<4x128xf32>
    %8 = arith.subf %3, %4 : vector<4x128xf32>
    %9 = math.absf %8 : vector<4x128xf32>
    %cst_6 = arith.constant 0.000000e+00 : f32
    %10 = vector.broadcast %cst_6 : f32 to vector<4x128xf32>
    %11 = arith.select %6, %9, %10 : vector<4x128xi1>, vector<4x128xf32>
    %12 = arith.addf %7, %11 : vector<4x128xf32>
    %c0_7 = arith.constant 0 : index
    %c0_8 = arith.constant 0 : index
    %13 = vector.load %arg5[%c0_7, %c0_8] : memref<4x128xf32, #tpu.memory_space<vmem>>, vector<4x128xf32>
    tpu.vector_store %arg5[%c0_7, %c0_8], %12 {strides = array<i32>} : memref<4x128xf32, #tpu.memory_space<vmem>>, vector<4x128xf32>,
    %c0_9 = arith.constant 0 : index
    %c0_10 = arith.constant 0 : index
    %14 = vector.load %arg6[%c0_9, %c0_10] : memref<4x128xf32, #tpu.memory_space<vmem>>, vector<4x128xf32>
    %cst_11 = arith.constant 1.000000e+00 : f32
    %cst_12 = arith.constant 0.000000e+00 : f32
    %15 = vector.broadcast %cst_11 : f32 to vector<4x128xf32>
    %16 = vector.broadcast %cst_12 : f32 to vector<4x128xf32>
    %17 = arith.select %6, %15, %16 : vector<4x128xi1>, vector<4x128xf32>
    %18 = arith.addf %14, %17 : vector<4x128xf32>
    %c0_13 = arith.constant 0 : index
    %c0_14 = arith.constant 0 : index
    %19 = vector.load %arg6[%c0_13, %c0_14] : memref<4x128xf32, #tpu.memory_space<vmem>>, vector<4x128xf32>
    tpu.vector_store %arg6[%c0_13, %c0_14], %18 {strides = array<i32>} : memref<4x128xf32, #tpu.memory_space<vmem>>, vector<4x128xf32>,
    %c0_i32_15 = arith.constant 0 : i32
    %20 = arith.cmpi eq, %arg1, %c0_i32_15 : i32
    %21 = arith.extui %20 : i1 to i32
    %c0_i32_16 = arith.constant 0 : i32
    %22 = arith.cmpi ne, %21, %c0_i32_16 : i32
    scf.if %22 {
      %c0_17 = arith.constant 0 : index
      %c0_18 = arith.constant 0 : index
      %23 = vector.load %arg5[%c0_17, %c0_18] : memref<4x128xf32, #tpu.memory_space<vmem>>, vector<4x128xf32>
      %24 = vector.shape_cast %23 : vector<4x128xf32> to vector<1x4x128xf32>
      %cst_19 = arith.constant dense<0.000000e+00> : vector<1xf32>
      %25 = vector.multi_reduction <add>, %24, %cst_19 [1, 2] : vector<1x4x128xf32> to vector<1xf32>
      %26 = vector.shape_cast %25 : vector<1xf32> to vector<1x1x1xf32>
      %27 = vector.extract %26[0, 0, 0] : f32 from vector<1x1x1xf32>
      %c0_20 = arith.constant 0 : index
      %c0_21 = arith.constant 0 : index
      %28 = vector.load %arg6[%c0_20, %c0_21] : memref<4x128xf32, #tpu.memory_space<vmem>>, vector<4x128xf32>
      %29 = vector.shape_cast %28 : vector<4x128xf32> to vector<1x4x128xf32>
      %cst_22 = arith.constant dense<0.000000e+00> : vector<1xf32>
      %30 = vector.multi_reduction <add>, %29, %cst_22 [1, 2] : vector<1x4x128xf32> to vector<1xf32>
      %31 = vector.shape_cast %30 : vector<1xf32> to vector<1x1x1xf32>
      %32 = vector.extract %31[0, 0, 0] : f32 from vector<1x1x1xf32>
      %33 = tpu.iota {dimensions = array<i32: 1>} : vector<1x2x128xi32>
      %c0_i32_23 = arith.constant 0 : i32
      %34 = vector.broadcast %c0_i32_23 : i32 to vector<1x2x128xi32>
      %35 = arith.cmpi eq, %33, %34 : vector<1x2x128xi32>
      %36 = vector.broadcast %27 : f32 to vector<1x2x128xf32>
      %37 = vector.broadcast %32 : f32 to vector<1x2x128xf32>
      %38 = arith.select %35, %36, %37 : vector<1x2x128xi1>, vector<1x2x128xf32>
      %c0_24 = arith.constant 0 : index
      %c0_25 = arith.constant 0 : index
      %c0_26 = arith.constant 0 : index
      %39 = vector.load %arg4[%c0_24, %c0_25, %c0_26] : memref<1x2x128xf32, #tpu.memory_space<vmem>>, vector<1x2x128xf32>
      tpu.vector_store %arg4[%c0_24, %c0_25, %c0_26], %38 {strides = array<i32>} : memref<1x2x128xf32, #tpu.memory_space<vmem>>, vector<1x2x128xf32>,
    } else {
    }
    return
  }
  func.func @transform_0(%arg0: i32, %arg1: i32) -> (i32, i32) {
    %c1_i32 = arith.constant 1 : i32
    %0 = arith.muli %arg0, %c1_i32 : i32
    %1 = arith.addi %0, %arg1 : i32
    %c0_i32 = arith.constant 0 : i32
    %c0_i32_0 = arith.constant 0 : i32
    return %1, %c0_i32 : i32, i32
  }
  func.func @transform_1(%arg0: i32, %arg1: i32) -> (i32, i32) {
    %c1_i32 = arith.constant 1 : i32
    %0 = arith.muli %arg0, %c1_i32 : i32
    %1 = arith.addi %0, %arg1 : i32
    %c0_i32 = arith.constant 0 : i32
    %c0_i32_0 = arith.constant 0 : i32
    return %1, %c0_i32 : i32, i32
  }
  func.func @transform_2(%arg0: i32, %arg1: i32) -> (i32, i32, i32) {
    %c0_i32 = arith.constant 0 : i32
    %c0_i32_0 = arith.constant 0 : i32
    %c0_i32_1 = arith.constant 0 : i32
    return %arg0, %c0_i32, %c0_i32_0 : i32, i32, i32
  }
}

</mosaic_0001>

<bundles_post_ra>
// kernel: tpu_custom_call.1
= control target key start
LH: loop header
LB: loop body
LE: loop exit
PB: predicated region body
PF: predicated region fallthrough
CT: control target
= control target key end

     0   :  { %7 = vsyncpa [#allocation5], 0  ;;  %s247_s0 = inlined_call_operand.hbm [shape: f32[4,128], index: 0, kind: input, shape index: {}]   ;;  %s248_s1 = inlined_call_operand.hbm [shape: f32[4,128], index: 1, kind: input, shape index: {}]   ;;  %s249_s2 = inlined_call_operand.hbm [shape: f32[1,2,128], index: 2, kind: output, shape index: {}]  }
   0x1   :  { %8 = vsyncpa [#allocation8], 0 }
   0x2   :  { %9 = vsyncpa [#allocation6], 0  ;;  %s192_s9 = smov [#allocation4]   ;;  %s193_s11 = smov [#allocation7]  }
   0x3   :  { %s19_s10 = sshll.u32 %s192_s9, 4  ;;  %s32_s12 = sshll.u32 %s193_s11, 4  ;;  %s20_s10 = int_to_ptr.vmem [resolvable:$true] %s19_s10  ;;  %s33_s12 = int_to_ptr.vmem [resolvable:$true] %s32_s12 }
   0x4   :  { %s120_s15 = scalar_lea.hbm %s247_s0, 64 }
   0x5   :  { %p121_p0 = scmp.ne.s32.totalorder %s247_s0, %s120_s15  ;;  %p124_p1 = scmp.lt.u32.totalorder %s120_s15, %s247_s0 }
   0x7   :  { %p126_p2 = pnand %p124_p1, %p121_p0 }
   0x9   :  { %129 = shalt.err (!%p126_p2)
}
   0xa   :  { %s130_s20 = scalar_lea.vmem %s20_s10, 64  ;;  %p135_p4 = scmp.lt.s32.totalorder %s20_s10, %s20_s10 }
   0xb   :  { %p131_p3 = scmp.ne.s32.totalorder %s20_s10, %s130_s20  ;;  %p136_p5 = scmp.lt.s32.totalorder %s130_s20, %s130_s20 }
   0xd   :  { %p137_p6 = por %p136_p5, %p135_p4 }
   0xf   :  { %p138_p7 = pnand %p137_p6, %p131_p3 }
  0x11   :  { %141 = shalt.err (!%p138_p7)
}
  0x12   :  { %22 = dma.hbm_to_vmem [thread:$0]  %s247_s0, 64, %s20_s10, [#allocation5]  }
  0x13   :  { %s142_s25 = scalar_lea.hbm %s248_s1, 64 }
  0x14   :  { %p143_p8 = scmp.ne.s32.totalorder %s248_s1, %s142_s25  ;;  %p146_p9 = scmp.lt.u32.totalorder %s142_s25, %s248_s1 }
  0x16   :  { %p148_p10 = pnand %p146_p9, %p143_p8 }
  0x18   :  { %151 = shalt.err (!%p148_p10)
}
  0x19   :  { %s152_s30 = scalar_lea.vmem %s33_s12, 64  ;;  %p157_p12 = scmp.lt.s32.totalorder %s33_s12, %s33_s12 }
  0x1a   :  { %p153_p11 = scmp.ne.s32.totalorder %s33_s12, %s152_s30  ;;  %p158_p13 = scmp.lt.s32.totalorder %s152_s30, %s152_s30 }
  0x1c   :  { %p159_p0 = por %p158_p13, %p157_p12 }
  0x1e   :  { %p160_p1 = pnand %p159_p0, %p153_p11 }
  0x20   :  { %163 = shalt.err (!%p160_p1)
}
  0x21   :  { %35 = dma.hbm_to_vmem [thread:$0]  %s248_s1, 64, %s33_s12, [#allocation8]  }
  0x22   :  { %186 = dma.done.wait [#allocation5], 64  }
  0x23   :  { %187 = vsyncadd [#allocation5], 4294967232 }
  0x24   :  { %188 = dma.done.wait [#allocation8], 64  }
  0x25   :  { %189 = vsyncadd [#allocation8], 4294967232  ;;  %v194_v0 = vmov 0.0   ;;  %v50_v1 = vld [vmem:[#allocation4] sm:$0xf]  ;;  %vm67_vm1 = vcmask 1043456   ;;  %v89_v29 = vlaneseq }
  0x26   :  { %48 = vst [vmem:[#allocation2] sm:$0xf] %v194_v0  ;;  %49 = vst [vmem:[#allocation3] sm:$0xf] %v194_v0  ;;  %v51_v2 = vld [vmem:[#allocation7] sm:$0xf] }
  0x27   :  { %vm52_vm0 = vcmp.gt.f32.partialorder %v51_v2, 0.0  ;;  %v54_v3 = vsub.f32 %v50_v1, %v51_v2  ;;  %v90_v30 = vshrl.u32 %v89_v29, 7  ;;  %s195_s4 = smov [#allocation9]  }
  0x28   :  { %v60_v5 = vsel %vm52_vm0, 1.0, %v194_v0  ;;  %s102_s5 = sshll.u32 %s195_s4, 4  ;;  %s103_s5 = int_to_ptr.vmem [resolvable:$true] %s102_s5 }
  0x29   :  { %v55_v7 = vand.u32 2147483647, %v54_v3  ;;  %vm91_vm2 = vcmp.eq.s32.totalorder %v90_v30, 0  ;;  %s164_s7 = scalar_lea.vmem %s103_s5, 32  ;;  %p169_p3 = scmp.lt.s32.totalorder %s103_s5, %s103_s5 }
  0x2a   :  { %p165_p2 = scmp.ne.s32.totalorder %s103_s5, %s164_s7  ;;  %p170_p4 = scmp.lt.s32.totalorder %s164_s7, %s164_s7 }
  0x2b   :  { %v56_v9 = vsel %vm52_vm0, %v55_v7, 0.0 }
  0x2c   :  { %p171_p5 = por %p170_p4, %p169_p3 }
  0x2d   :  { %v59_v4 = vld [vmem:[#allocation3] sm:$0xf]  ;;  %v53_v6 = vld [vmem:[#allocation2] sm:$0xf] }
  0x2e   :  { %v61_v8 = vadd.f32 %v60_v5, %v59_v4  ;;  %v57_v10 = vadd.f32 %v56_v9, %v53_v6  ;;  %p172_p6 = pnand %p171_p5, %p165_p2 }
  0x30   :  { %62 = vst [vmem:[#allocation3] sm:$0xf] %v61_v8  ;;  %58 = vst [vmem:[#allocation2] sm:$0xf] %v57_v10 }
  0x37   :  { %v66_v11 = vld [vmem:[#allocation2] sm:$0xf]  ;;  %v78_v12 = vld [vmem:[#allocation3] sm:$0xf] }
  0x38   :  { %v68_v13 = vsel %vm67_vm1, %v66_v11, 0.0  ;;  %v79_v14 = vsel %vm67_vm1, %v78_v12, 0.0 }
  0x39   :  { %69 = vadd.xlane.f32.xlu0 %v68_v13 }
  0x3d   :  { %80 = vadd.xlane.f32.xlu0 %v79_v14 }
  0xc6   :  { %v70_v15 = vpop.xlane.xlu0 %69 }
  0xc7   :  { %v71_v16 = vrot.slane %v70_v15, 4 }
  0xc9   :  { %v72_v17 = vadd.f32 %v71_v16, %v70_v15 }
  0xca   :  { %v81_v18 = vpop.xlane.xlu0 %80 }
  0xcb   :  { %v73_v19 = vrot.slane %v72_v17, 2  ;;  %v82_v20 = vrot.slane %v81_v18, 4 }
  0xcd   :  { %v83_v21 = vadd.f32 %v82_v20, %v81_v18  ;;  %v74_v22 = vadd.f32 %v73_v19, %v72_v17 }
  0xcf   :  { %v84_v23 = vrot.slane %v83_v21, 2  ;;  %v75_v24 = vrot.slane %v74_v22, 1 }
  0xd1   :  { %v85_v25 = vadd.f32 %v84_v23, %v83_v21  ;;  %v76_v26 = vadd.f32 %v75_v24, %v74_v22 }
  0xd3   :  { %112 = vpush %v76_v26  ;;  %v86_v27 = vrot.slane %v85_v25, 1 }
  0xd5   :  { %v87_v28 = vadd.f32 %v86_v27, %v85_v25 }
  0xd7   :  { %114 = vpush %v87_v28 }
 0x104   :  { %s113_s1 = spop %112 }
 0x105   :  { %v92_v31 = vstv %s113_s1 }
 0x108   :  { %s115_s6 = spop %114 }
 0x109   :  { %v93_v32 = vstv %s115_s6 }
 0x10a   :  { %v94_v33 = vsel %vm91_vm2, %v92_v31, %v93_v32 }
 0x10b   :  { %95 = vst [vmem:[#allocation9] sm:$0x3] %v94_v33 }
 0x10c   :  { %175 = shalt.err (!%p172_p6)
}
 0x10d   :  { %s176_s10 = scalar_lea.hbm %s249_s2, 32 }
 0x10e   :  { %p177_p7 = scmp.ne.s32.totalorder %s249_s2, %s176_s10  ;;  %p180_p8 = scmp.lt.u32.totalorder %s176_s10, %s249_s2 }
 0x110   :  { %p182_p9 = pnand %p180_p8, %p177_p7 }
 0x112   :  { %185 = shalt.err (!%p182_p9)
}
 0x113   :  { %105 = dma.vmem_to_hbm [thread:$0]  %s103_s5, 32, %s249_s2, [#allocation6]  }
 0x114   :  { %190 = dma.done.wait [#allocation6], 32  }
 0x115   :  { %191 = vsyncadd [#allocation6], 4294967264 }
 0x116   :  { %109 = vsyncpa [#allocation5], 1 }
 0x117   :  { %110 = vsyncpa [#allocation8], 1 }
 0x118   :  { %111 = vsyncpa [#allocation6], 1 }

</bundles_post_ra>
